<compile_context>
chip_gen: v7x
topology: tpu7x:2x2x1
jax: 0.10.0
libtpu: 0.0.40
codegen_flags: <defaults>
</compile_context>

<pallas_src>
import functools

import jax
import jax.numpy as jnp
from jax.experimental import pallas as pl
from jax.experimental.pallas import tpu as pltpu


def _round_up(x, m):
    return ((x + m - 1) // m) * m


def _disc_xz_kernel(negative_slope,
                    x_ref, z_ref,
                    w1x_ref, w1z_ref, b1_ref,
                    w1xz_ref, b1xz_ref,
                    w2_ref, b2_ref,
                    out_ref):
    ns = negative_slope

    # Layer 1: fc_1x (BN folded) | fc_1z packed into ONE lane tile.
    #   x-half -> lanes [0, F), z-half -> lanes [F, 2F).  Dropout = identity (eval).
    h1 = (jnp.dot(x_ref[...], w1x_ref[...], preferred_element_type=jnp.float32)
          + jnp.dot(z_ref[...], w1z_ref[...], preferred_element_type=jnp.float32)
          + b1_ref[...])
    h1 = jnp.where(h1 >= 0, h1, ns * h1)                               # (TB, H1)

    # fc_1xz over the packed slab -> mid on lanes [0, F), exact zeros elsewhere.
    h2 = jnp.dot(h1, w1xz_ref[...], preferred_element_type=jnp.float32) + b1xz_ref[...]
    h2 = jnp.where(h2 >= 0, h2, ns * h2)                               # (TB, H2)

    # fc_2xz, with its weight columns shifted so logits land on lanes [F, F+C)
    # (exact zeros on [0, F)).
    lg = jnp.dot(h2, w2_ref[...], preferred_element_type=jnp.float32) + b2_ref[...]

    # Fused output slab: lanes [0,F) = mid, lanes [F,F+C) = logits, rest zero.
    out_ref[...] = (h2 + lg).astype(out_ref.dtype)


def prepare_discriminator_xz_params(params, *, bn_eps=1e-5):
    """One-time weight preparation (hoisted out of the per-call forward):
    eval-mode BatchNorm fold into fc_1x, lane packing and zero padding."""
    in_features, F = params["w1x"].shape
    latent_dim = params["w1z"].shape[0]
    C = params["w2"].shape[1]

    H1 = _round_up(2 * F, 128)          # packed layer-1 width: x [0,F), z [F,2F)
    H2 = _round_up(F + C, 128)          # fused  mid|logits output width

    # Fold eval-mode BatchNorm1d (running stats) into fc_1x.
    scale = params["bn_gamma"] * jax.lax.rsqrt(params["bn_var"] + bn_eps)   # (1, F)
    w1x_f = params["w1x"] * scale
    b1x_f = (params["b1x"] - params["bn_mean"]) * scale + params["bn_beta"]

    w1x = jnp.zeros((in_features, H1), jnp.float32).at[:, :F].set(w1x_f)
    w1z = jnp.zeros((latent_dim, H1), jnp.float32).at[:, F:2 * F].set(params["w1z"])
    b1 = jnp.zeros((1, H1), jnp.float32)
    b1 = b1.at[:, :F].set(b1x_f)
    b1 = b1.at[:, F:2 * F].set(params["b1z"])

    w1xz = jnp.zeros((H1, H2), jnp.float32)
    w1xz = w1xz.at[:F, :F].set(params["w1xz_x"])
    w1xz = w1xz.at[F:2 * F, :F].set(params["w1xz_z"])
    b1xz = jnp.zeros((1, H2), jnp.float32).at[:, :F].set(params["b1xz"])

    # fc_2xz, shifted so logits occupy lanes [F, F+C) of the fused output slab.
    w2 = jnp.zeros((H2, H2), jnp.float32).at[:F, F:F + C].set(params["w2"])
    b2 = jnp.zeros((1, H2), jnp.float32).at[:, F:F + C].set(params["b2"])

    return {
        "w1x": w1x, "w1z": w1z, "b1": b1,
        "w1xz": w1xz, "b1xz": b1xz,
        "w2": w2, "b2": b2,
        "dims": (in_features, latent_dim, F, C, H1, H2),
    }


def _choose_batch_tile(B, block_b):
    """>= 2 grid steps when B > 16 (v7x dual-TC sharding), big tiles for big B
    (per-step overhead amortization on v5e/v6e), bounded padding waste."""
    B8 = _round_up(B, 8)
    if B8 <= 16:
        return B8                       # too small to split usefully
    n_steps = max(2, pl.cdiv(B8, block_b))
    return min(_round_up(pl.cdiv(B8, n_steps), 8), B8)


def discriminator_xz_forward(X, Z, prepared, *, negative_slope=0.2, block_b=2048):
    in_features, latent_dim, F, C, H1, H2 = prepared["dims"]
    B = X.shape[0]
    assert X.shape == (B, in_features) and Z.shape == (B, latent_dim)

    X = X.astype(jnp.float32)
    Z = Z.astype(jnp.float32)

    TB = _choose_batch_tile(B, block_b)
    B_pad = _round_up(B, TB)
    if B_pad != B:
        X = jnp.pad(X, ((0, B_pad - B), (0, 0)))
        Z = jnp.pad(Z, ((0, B_pad - B), (0, 0)))
    grid = (B_pad // TB,)

    batch = lambda i: (i, 0)            # activations: tiled along batch
    const = lambda i: (0, 0)            # weights/biases: VMEM-resident constants

    out = pl.pallas_call(
        functools.partial(_disc_xz_kernel, negative_slope),
        grid=grid,
        in_specs=[
            pl.BlockSpec((TB, in_features), batch),
            pl.BlockSpec((TB, latent_dim), batch),
            pl.BlockSpec((in_features, H1), const),
            pl.BlockSpec((latent_dim, H1), const),
            pl.BlockSpec((1, H1), const),
            pl.BlockSpec((H1, H2), const),
            pl.BlockSpec((1, H2), const),
            pl.BlockSpec((H2, H2), const),
            pl.BlockSpec((1, H2), const),
        ],
        out_specs=pl.BlockSpec((TB, H2), batch),
        out_shape=jax.ShapeDtypeStruct((B_pad, H2), jnp.float32),
        compiler_params=pltpu.CompilerParams(
            dimension_semantics=("parallel",)),
    )(X, Z, prepared["w1x"], prepared["w1z"], prepared["b1"],
      prepared["w1xz"], prepared["b1xz"], prepared["w2"], prepared["b2"])

    logits = out[:B, F:F + C]
    mid = out[:B, :F]
    return logits, mid


def init_params(key, in_features, out_features, latent_dim, n_classes):
    """Deterministic synthetic init (PyTorch-style uniform(-1/sqrt(fan_in), ...))."""
    def linear(k, fan_in, fan_out):
        kw, kb = jax.random.split(k)
        bound = 1.0 / jnp.sqrt(fan_in)
        w = jax.random.uniform(kw, (fan_in, fan_out), jnp.float32, -bound, bound)
        b = jax.random.uniform(kb, (1, fan_out), jnp.float32, -bound, bound)
        return w, b

    k1, k2, k3, k4 = jax.random.split(key, 4)
    w1x, b1x = linear(k1, in_features, out_features)
    w1z, b1z = linear(k2, latent_dim, out_features)
    w1xz, b1xz = linear(k3, 2 * out_features, out_features)
    w2, b2 = linear(k4, out_features, n_classes)

    return {
        "w1x": w1x, "b1x": b1x,
        "bn_gamma": jnp.ones((1, out_features), jnp.float32),
        "bn_beta": jnp.zeros((1, out_features), jnp.float32),
        "bn_mean": jnp.zeros((1, out_features), jnp.float32),
        "bn_var": jnp.ones((1, out_features), jnp.float32),
        "w1z": w1z, "b1z": b1z,
        # fc_1xz weight split into the x-half and z-half of the concat axis
        "w1xz_x": w1xz[:out_features], "w1xz_z": w1xz[out_features:],
        "b1xz": b1xz,
        "w2": w2, "b2": b2,
    }


def _reference_forward(X, Z, p, negative_slope=0.2, bn_eps=1e-5):
    lrelu = lambda v: jnp.where(v >= 0, v, negative_slope * v)
    x = X @ p["w1x"] + p["b1x"]
    x = (x - p["bn_mean"]) * jax.lax.rsqrt(p["bn_var"] + bn_eps) * p["bn_gamma"] + p["bn_beta"]
    x = lrelu(x)
    z = lrelu(Z @ p["w1z"] + p["b1z"])
    xz = jnp.concatenate([x, z], axis=1)
    w1xz = jnp.concatenate([p["w1xz_x"], p["w1xz_z"]], axis=0)
    mid = lrelu(xz @ w1xz + p["b1xz"])
    logits = mid @ p["w2"] + p["b2"]
    return logits, mid


if __name__ == "__main__":
    B, in_features, out_features, latent_dim, n_classes = 8, 32, 32, 16, 1

    key = jax.random.PRNGKey(0)
    kx, kz, kp = jax.random.split(key, 3)
    X = jax.random.normal(kx, (B, in_features), jnp.float32)
    Z = jax.random.normal(kz, (B, latent_dim), jnp.float32)
    params = init_params(kp, in_features, out_features, latent_dim, n_classes)

    prepared = prepare_discriminator_xz_params(params)       # once, not per call
    logits, mid = discriminator_xz_forward(X, Z, prepared)
    jax.block_until_ready((logits, mid))

    ref_logits, ref_mid = _reference_forward(X, Z, params)
    assert logits.shape == (B, n_classes) and mid.shape == (B, out_features)
    # all-f32 kernel -> tight tolerance vs. the f32 reference
    assert jnp.allclose(logits, ref_logits, atol=1e-3, rtol=1e-3)
    assert jnp.allclose(mid, ref_mid, atol=1e-3, rtol=1e-3)

    print("KERNEL_OK")
</pallas_src>

<mosaic_0001>
module attributes {stable_mosaic.version = 11 : i64} {
  func.func @_disc_xz_kernel(%arg0: i32, %arg1: memref<8x32xf32, #tpu.memory_space<vmem>>, %arg2: memref<8x16xf32, #tpu.memory_space<vmem>>, %arg3: memref<32x128xf32, #tpu.memory_space<vmem>>, %arg4: memref<16x128xf32, #tpu.memory_space<vmem>>, %arg5: memref<1x128xf32, #tpu.memory_space<vmem>>, %arg6: memref<128x128xf32, #tpu.memory_space<vmem>>, %arg7: memref<1x128xf32, #tpu.memory_space<vmem>>, %arg8: memref<128x128xf32, #tpu.memory_space<vmem>>, %arg9: memref<1x128xf32, #tpu.memory_space<vmem>>, %arg10: memref<8x128xf32, #tpu.memory_space<vmem>>) attributes {dimension_semantics = [#tpu.dimension_semantics<parallel>], iteration_bounds = array<i64: 1>, scalar_prefetch = 0 : i64, scratch_operands = 0 : i64, tpu.core_type = #tpu.core_type<tc>, window_params = [{transform_indices = @transform_0, window_bounds = array<i64: 8, 32>}, {transform_indices = @transform_1, window_bounds = array<i64: 8, 16>}, {pipeline_mode = #tpu.pipeline_mode<synchronous>, transform_indices = @transform_2, window_bounds = array<i64: 32, 128>}, {pipeline_mode = #tpu.pipeline_mode<synchronous>, transform_indices = @transform_3, window_bounds = array<i64: 16, 128>}, {pipeline_mode = #tpu.pipeline_mode<synchronous>, transform_indices = @transform_4, window_bounds = array<i64: 1, 128>}, {pipeline_mode = #tpu.pipeline_mode<synchronous>, transform_indices = @transform_5, window_bounds = array<i64: 128, 128>}, {pipeline_mode = #tpu.pipeline_mode<synchronous>, transform_indices = @transform_6, window_bounds = array<i64: 1, 128>}, {pipeline_mode = #tpu.pipeline_mode<synchronous>, transform_indices = @transform_7, window_bounds = array<i64: 128, 128>}, {pipeline_mode = #tpu.pipeline_mode<synchronous>, transform_indices = @transform_8, window_bounds = array<i64: 1, 128>}, {transform_indices = @transform_9, window_bounds = array<i64: 8, 128>}]} {
    %c0 = arith.constant 0 : index
    %c0_0 = arith.constant 0 : index
    %0 = vector.load %arg1[%c0, %c0_0] : memref<8x32xf32, #tpu.memory_space<vmem>>, vector<8x32xf32>
    %c0_1 = arith.constant 0 : index
    %c0_2 = arith.constant 0 : index
    %1 = vector.load %arg3[%c0_1, %c0_2] : memref<32x128xf32, #tpu.memory_space<vmem>>, vector<32x128xf32>
    %cst = arith.constant dense<0.000000e+00> : vector<8x128xf32>
    %2 = tpu.matmul %0, %1, %cst {dimension_numbers = #tpu.dot_dimension_numbers<[1], [0], [0], [1], [0, 0, 1, 1], [], []>} : vector<8x32xf32>, vector<32x128xf32>, vector<8x128xf32> -> vector<8x128xf32>
    %c0_3 = arith.constant 0 : index
    %c0_4 = arith.constant 0 : index
    %3 = vector.load %arg2[%c0_3, %c0_4] : memref<8x16xf32, #tpu.memory_space<vmem>>, vector<8x16xf32>
    %c0_5 = arith.constant 0 : index
    %c0_6 = arith.constant 0 : index
    %4 = vector.load %arg4[%c0_5, %c0_6] : memref<16x128xf32, #tpu.memory_space<vmem>>, vector<16x128xf32>
    %cst_7 = arith.constant dense<0.000000e+00> : vector<8x128xf32>
    %5 = tpu.matmul %3, %4, %cst_7 {dimension_numbers = #tpu.dot_dimension_numbers<[1], [0], [0], [1], [0, 0, 1, 1], [], []>} : vector<8x16xf32>, vector<16x128xf32>, vector<8x128xf32> -> vector<8x128xf32>
    %6 = arith.addf %2, %5 : vector<8x128xf32>
    %c0_8 = arith.constant 0 : index
    %c0_9 = arith.constant 0 : index
    %7 = vector.load %arg5[%c0_8, %c0_9] : memref<1x128xf32, #tpu.memory_space<vmem>>, vector<1x128xf32>
    %8 = vector.broadcast %7 : vector<1x128xf32> to vector<8x128xf32>
    %9 = arith.addf %6, %8 : vector<8x128xf32>
    %cst_10 = arith.constant 0.000000e+00 : f32
    %10 = vector.broadcast %cst_10 : f32 to vector<8x128xf32>
    %11 = arith.cmpf oge, %9, %10 : vector<8x128xf32>
    %cst_11 = arith.constant 2.000000e-01 : f32
    %12 = vector.broadcast %cst_11 : f32 to vector<8x128xf32>
    %13 = arith.mulf %12, %9 : vector<8x128xf32>
    %14 = arith.select %11, %9, %13 : vector<8x128xi1>, vector<8x128xf32>
    %c0_12 = arith.constant 0 : index
    %c0_13 = arith.constant 0 : index
    %15 = vector.load %arg6[%c0_12, %c0_13] : memref<128x128xf32, #tpu.memory_space<vmem>>, vector<128x128xf32>
    %cst_14 = arith.constant dense<0.000000e+00> : vector<8x128xf32>
    %16 = tpu.matmul %14, %15, %cst_14 {dimension_numbers = #tpu.dot_dimension_numbers<[1], [0], [0], [1], [0, 0, 1, 1], [], []>} : vector<8x128xf32>, vector<128x128xf32>, vector<8x128xf32> -> vector<8x128xf32>
    %c0_15 = arith.constant 0 : index
    %c0_16 = arith.constant 0 : index
    %17 = vector.load %arg7[%c0_15, %c0_16] : memref<1x128xf32, #tpu.memory_space<vmem>>, vector<1x128xf32>
    %18 = vector.broadcast %17 : vector<1x128xf32> to vector<8x128xf32>
    %19 = arith.addf %16, %18 : vector<8x128xf32>
    %cst_17 = arith.constant 0.000000e+00 : f32
    %20 = vector.broadcast %cst_17 : f32 to vector<8x128xf32>
    %21 = arith.cmpf oge, %19, %20 : vector<8x128xf32>
    %cst_18 = arith.constant 2.000000e-01 : f32
    %22 = vector.broadcast %cst_18 : f32 to vector<8x128xf32>
    %23 = arith.mulf %22, %19 : vector<8x128xf32>
    %24 = arith.select %21, %19, %23 : vector<8x128xi1>, vector<8x128xf32>
    %c0_19 = arith.constant 0 : index
    %c0_20 = arith.constant 0 : index
    %25 = vector.load %arg8[%c0_19, %c0_20] : memref<128x128xf32, #tpu.memory_space<vmem>>, vector<128x128xf32>
    %cst_21 = arith.constant dense<0.000000e+00> : vector<8x128xf32>
    %26 = tpu.matmul %24, %25, %cst_21 {dimension_numbers = #tpu.dot_dimension_numbers<[1], [0], [0], [1], [0, 0, 1, 1], [], []>} : vector<8x128xf32>, vector<128x128xf32>, vector<8x128xf32> -> vector<8x128xf32>
    %c0_22 = arith.constant 0 : index
    %c0_23 = arith.constant 0 : index
    %27 = vector.load %arg9[%c0_22, %c0_23] : memref<1x128xf32, #tpu.memory_space<vmem>>, vector<1x128xf32>
    %28 = vector.broadcast %27 : vector<1x128xf32> to vector<8x128xf32>
    %29 = arith.addf %26, %28 : vector<8x128xf32>
    %30 = arith.addf %24, %29 : vector<8x128xf32>
    %c0_24 = arith.constant 0 : index
    %c0_25 = arith.constant 0 : index
    %31 = vector.load %arg10[%c0_24, %c0_25] : memref<8x128xf32, #tpu.memory_space<vmem>>, vector<8x128xf32>
    tpu.vector_store %arg10[%c0_24, %c0_25], %30 {strides = array<i32>} : memref<8x128xf32, #tpu.memory_space<vmem>>, vector<8x128xf32>,
    return
  }
  func.func @transform_0(%arg0: i32) -> (i32, i32) {
    %c0_i32 = arith.constant 0 : i32
    %c0_i32_0 = arith.constant 0 : i32
    return %arg0, %c0_i32 : i32, i32
  }
  func.func @transform_1(%arg0: i32) -> (i32, i32) {
    %c0_i32 = arith.constant 0 : i32
    %c0_i32_0 = arith.constant 0 : i32
    return %arg0, %c0_i32 : i32, i32
  }
  func.func @transform_2(%arg0: i32) -> (i32, i32) {
    %c0_i32 = arith.constant 0 : i32
    %c0_i32_0 = arith.constant 0 : i32
    %c0_i32_1 = arith.constant 0 : i32
    return %c0_i32, %c0_i32_0 : i32, i32
  }
  func.func @transform_3(%arg0: i32) -> (i32, i32) {
    %c0_i32 = arith.constant 0 : i32
    %c0_i32_0 = arith.constant 0 : i32
    %c0_i32_1 = arith.constant 0 : i32
    return %c0_i32, %c0_i32_0 : i32, i32
  }
  func.func @transform_4(%arg0: i32) -> (i32, i32) {
    %c0_i32 = arith.constant 0 : i32
    %c0_i32_0 = arith.constant 0 : i32
    %c0_i32_1 = arith.constant 0 : i32
    return %c0_i32, %c0_i32_0 : i32, i32
  }
  func.func @transform_5(%arg0: i32) -> (i32, i32) {
    %c0_i32 = arith.constant 0 : i32
    %c0_i32_0 = arith.constant 0 : i32
    %c0_i32_1 = arith.constant 0 : i32
    return %c0_i32, %c0_i32_0 : i32, i32
  }
  func.func @transform_6(%arg0: i32) -> (i32, i32) {
    %c0_i32 = arith.constant 0 : i32
    %c0_i32_0 = arith.constant 0 : i32
    %c0_i32_1 = arith.constant 0 : i32
    return %c0_i32, %c0_i32_0 : i32, i32
  }
  func.func @transform_7(%arg0: i32) -> (i32, i32) {
    %c0_i32 = arith.constant 0 : i32
    %c0_i32_0 = arith.constant 0 : i32
    %c0_i32_1 = arith.constant 0 : i32
    return %c0_i32, %c0_i32_0 : i32, i32
  }
  func.func @transform_8(%arg0: i32) -> (i32, i32) {
    %c0_i32 = arith.constant 0 : i32
    %c0_i32_0 = arith.constant 0 : i32
    %c0_i32_1 = arith.constant 0 : i32
    return %c0_i32, %c0_i32_0 : i32, i32
  }
  func.func @transform_9(%arg0: i32) -> (i32, i32) {
    %c0_i32 = arith.constant 0 : i32
    %c0_i32_0 = arith.constant 0 : i32
    return %arg0, %c0_i32 : i32, i32
  }
}

</mosaic_0001>

<bundles_post_ra>
// kernel: tpu_custom_call.1
= control target key start
LH: loop header
LB: loop body
LE: loop exit
PB: predicated region body
PF: predicated region fallthrough
CT: control target
= control target key end

     0   :  { %14 = vsyncpa [#allocation3], 0  ;;  %s1045_s0 = inlined_call_operand.hbm [shape: f32[8,32], index: 0, kind: input, shape index: {}]   ;;  %s1046_s1 = inlined_call_operand.hbm [shape: f32[8,16], index: 1, kind: input, shape index: {}]   ;;  %s1047_s2 = inlined_call_operand.hbm [shape: f32[32,128], index: 2, kind: input, shape index: {}]   ;;  %s1048_s3 = inlined_call_operand.hbm [shape: f32[16,128], index: 3, kind: input, shape index: {}]   ;;  %s1049_s4 = inlined_call_operand.vmem [shape: f32[1,128], index: 4, kind: input, shape index: {}]   ;;  %s1050_s5 = inlined_call_operand.hbm [shape: f32[128,128], index: 5, kind: input, shape index: {}]   ;;  %s1051_s6 = inlined_call_operand.vmem [shape: f32[1,128], index: 6, kind: input, shape index: {}]   ;;  %s1052_s7 = inlined_call_operand.hbm [shape: f32[128,128], index: 7, kind: input, shape index: {}]   ;;  %s1053_s8 = inlined_call_operand.vmem [shape: f32[1,128], index: 8, kind: input, shape index: {}]   ;;  %s1054_s9 = inlined_call_operand.hbm [shape: f32[8,128], index: 9, kind: output, shape index: {}]  }
   0x1   :  { %15 = vsyncpa [#allocation6], 0 }
   0x2   :  { %16 = vsyncpa [#allocation9], 0 }
   0x3   :  { %17 = vsyncpa [#allocation12], 0 }
   0x4   :  { %18 = vsyncpa [#allocation4], 0  ;;  %s855_s30 = smov [#allocation5]   ;;  %s691_s13 = scalar_lea.hbm %s1046_s1, 128 }
   0x5   :  { %s35_s10 = sshll.u32 %s855_s30, 4  ;;  %p692_p0 = scmp.ne.s32.totalorder %s1046_s1, %s691_s13  ;;  %s36_s10 = int_to_ptr.vmem [resolvable:$true] %s35_s10 }
   0x6   :  { %p695_p1 = scmp.lt.u32.totalorder %s691_s13, %s1046_s1 }
   0x8   :  { %p697_p2 = pnand %p695_p1, %p692_p0 }
   0xa   :  { %700 = shalt.err (!%p697_p2)
}
   0xb   :  { %s701_s18 = scalar_lea.vmem %s36_s10, 128  ;;  %p706_p4 = scmp.lt.s32.totalorder %s36_s10, %s36_s10 }
   0xc   :  { %p702_p3 = scmp.ne.s32.totalorder %s36_s10, %s701_s18  ;;  %p707_p5 = scmp.lt.s32.totalorder %s701_s18, %s701_s18 }
   0xe   :  { %p708_p6 = por %p707_p5, %p706_p4 }
  0x10   :  { %p709_p7 = pnand %p708_p6, %p702_p3 }
  0x12   :  { %712 = shalt.err (!%p709_p7)
}
  0x13   :  { %38 = dma.hbm_to_vmem [thread:$0]  %s1046_s1, 128, %s36_s10, [#allocation6]  }
  0x14   :  { %s856_s21 = smov [#allocation8]   ;;  %s857_s23 = smov [#allocation2]  }
  0x15   :  { %s56_s22 = sshll.u32 %s856_s21, 4  ;;  %s25_s24 = sshll.u32 %s857_s23, 4  ;;  %s57_s22 = int_to_ptr.vmem [resolvable:$true] %s56_s22  ;;  %s26_s24 = int_to_ptr.vmem [resolvable:$true] %s25_s24 }
  0x16   :  { %s713_s27 = scalar_lea.hbm %s1048_s3, 256 }
  0x17   :  { %p714_p8 = scmp.ne.s32.totalorder %s1048_s3, %s713_s27  ;;  %p717_p9 = scmp.lt.u32.totalorder %s713_s27, %s1048_s3 }
  0x19   :  { %p719_p10 = pnand %p717_p9, %p714_p8 }
  0x1b   :  { %722 = shalt.err (!%p719_p10)
}
  0x1c   :  { %s723_s1 = scalar_lea.vmem %s57_s22, 256  ;;  %p728_p12 = scmp.lt.s32.totalorder %s57_s22, %s57_s22 }
  0x1d   :  { %p724_p11 = scmp.ne.s32.totalorder %s57_s22, %s723_s1  ;;  %p729_p13 = scmp.lt.s32.totalorder %s723_s1, %s723_s1 }
  0x1f   :  { %p730_p0 = por %p729_p13, %p728_p12 }
  0x21   :  { %p731_p1 = pnand %p730_p0, %p724_p11 }
  0x23   :  { %734 = shalt.err (!%p731_p1)
}
  0x24   :  { %s858_s10 = smov 128   ;;  %s859_s12 = smov 8  }
  0x25   :  { %62 = dma.hbm_to_vmem [thread:$0]  %s1048_s3, 256, %s57_s22, [#allocation9], %s858_s10, %s858_s10, %s859_s12  }
  0x26   :  { %s735_s17 = scalar_lea.hbm %s1045_s0, 128 }
  0x27   :  { %p736_p2 = scmp.ne.s32.totalorder %s1045_s0, %s735_s17  ;;  %p739_p3 = scmp.lt.u32.totalorder %s735_s17, %s1045_s0 }
  0x29   :  { %p741_p4 = pnand %p739_p3, %p736_p2 }
  0x2b   :  { %744 = shalt.err (!%p741_p4)
}
  0x2c   :  { %s745_s23 = scalar_lea.vmem %s26_s24, 128  ;;  %p750_p6 = scmp.lt.s32.totalorder %s26_s24, %s26_s24 }
  0x2d   :  { %p746_p5 = scmp.ne.s32.totalorder %s26_s24, %s745_s23  ;;  %p751_p7 = scmp.lt.s32.totalorder %s745_s23, %s745_s23 }
  0x2f   :  { %p752_p8 = por %p751_p7, %p750_p6 }
  0x31   :  { %p753_p9 = pnand %p752_p8, %p746_p5 }
  0x33   :  { %756 = shalt.err (!%p753_p9)
}
  0x34   :  { %28 = dma.hbm_to_vmem [thread:$0]  %s1045_s0, 128, %s26_s24, [#allocation3]  }
  0x35   :  { %s860_s25 = smov [#allocation7]   ;;  %s861_s27 = smov [#allocation10]  }
  0x36   :  { %s44_s26 = sshll.u32 %s860_s25, 4  ;;  %s70_s28 = sshll.u32 %s861_s27, 4  ;;  %s45_s26 = int_to_ptr.vmem [resolvable:$true] %s44_s26  ;;  %s71_s28 = int_to_ptr.vmem [resolvable:$true] %s70_s28 }
  0x37   :  { %s757_s11 = scalar_lea.hbm %s1047_s2, 512 }
  0x38   :  { %p758_p10 = scmp.ne.s32.totalorder %s1047_s2, %s757_s11  ;;  %p761_p11 = scmp.lt.u32.totalorder %s757_s11, %s1047_s2 }
  0x3a   :  { %p763_p12 = pnand %p761_p11, %p758_p10 }
  0x3c   :  { %766 = shalt.err (!%p763_p12)
}
  0x3d   :  { %s767_s0 = scalar_lea.vmem %s45_s26, 512  ;;  %p772_p0 = scmp.lt.s32.totalorder %s45_s26, %s45_s26 }
  0x3e   :  { %p768_p13 = scmp.ne.s32.totalorder %s45_s26, %s767_s0  ;;  %p773_p1 = scmp.lt.s32.totalorder %s767_s0, %s767_s0 }
  0x40   :  { %p774_p2 = por %p773_p1, %p772_p0 }
  0x42   :  { %p775_p3 = pnand %p774_p2, %p768_p13 }
  0x44   :  { %778 = shalt.err (!%p775_p3)
}
  0x45   :  { %50 = dma.hbm_to_vmem [thread:$0]  %s1047_s2, 512, %s45_s26, [#allocation6], %s858_s10, %s858_s10, %s859_s12  }
  0x46   :  { %s779_s19 = scalar_lea.hbm %s1050_s5, 2048 }
  0x47   :  { %p780_p4 = scmp.ne.s32.totalorder %s1050_s5, %s779_s19  ;;  %p783_p5 = scmp.lt.u32.totalorder %s779_s19, %s1050_s5 }
  0x49   :  { %p785_p6 = pnand %p783_p5, %p780_p4 }
  0x4b   :  { %788 = shalt.err (!%p785_p6)
}
  0x4c   :  { %s789_s22 = scalar_lea.vmem %s71_s28, 2048  ;;  %p794_p8 = scmp.lt.s32.totalorder %s71_s28, %s71_s28 }
  0x4d   :  { %p790_p7 = scmp.ne.s32.totalorder %s71_s28, %s789_s22  ;;  %p795_p9 = scmp.lt.s32.totalorder %s789_s22, %s789_s22 }
  0x4f   :  { %p796_p10 = por %p795_p9, %p794_p8 }
  0x51   :  { %p797_p11 = pnand %p796_p10, %p790_p7 }
  0x53   :  { %800 = shalt.err (!%p797_p11)
}
  0x54   :  { %76 = dma.hbm_to_vmem [thread:$0]  %s1050_s5, 2048, %s71_s28, [#allocation9], %s858_s10, %s858_s10, %s859_s12  }
  0x55   :  { %s862_s26 = smov [#allocation11]   ;;  %s801_s11 = scalar_lea.hbm %s1052_s7, 2048 }
  0x56   :  { %s84_s27 = sshll.u32 %s862_s26, 4  ;;  %p802_p12 = scmp.ne.s32.totalorder %s1052_s7, %s801_s11  ;;  %s85_s27 = int_to_ptr.vmem [resolvable:$true] %s84_s27 }
  0x57   :  { %p805_p13 = scmp.lt.u32.totalorder %s801_s11, %s1052_s7 }
  0x59   :  { %p807_p0 = pnand %p805_p13, %p802_p12 }
  0x5b   :  { %810 = shalt.err (!%p807_p0)
}
  0x5c   :  { %s811_s0 = scalar_lea.vmem %s85_s27, 2048  ;;  %p816_p2 = scmp.lt.s32.totalorder %s85_s27, %s85_s27 }
  0x5d   :  { %p812_p1 = scmp.ne.s32.totalorder %s85_s27, %s811_s0  ;;  %p817_p3 = scmp.lt.s32.totalorder %s811_s0, %s811_s0 }
  0x5f   :  { %p818_p4 = por %p817_p3, %p816_p2 }
  0x61   :  { %p819_p5 = pnand %p818_p4, %p812_p1 }
  0x63   :  { %822 = shalt.err (!%p819_p5)
}
  0x64   :  { %90 = dma.hbm_to_vmem [thread:$0]  %s1052_s7, 2048, %s85_s27, [#allocation12], %s858_s10, %s858_s10, %s859_s12  }
  0x65   :  { %845 = dma.done.wait [#allocation3], 128  }
  0x66   :  { %846 = vsyncadd [#allocation3], 4294967168 }
  0x67   :  { %847 = dma.done.wait [#allocation6], 640  }
  0x68   :  { %848 = vsyncadd [#allocation6], 4294966656 }
  0x69   :  { %849 = dma.done.wait [#allocation9], 2304  }
  0x6a   :  { %850 = vsyncadd [#allocation9], 4294964992 }
  0x6b   :  { %851 = dma.done.wait [#allocation12], 2048  }
  0x6c   :  { %852 = vsyncadd [#allocation12], 4294965248  ;;  %v863_v0 = vmov 0.0|0.0   ;;  %vm864_vm0 = vmmov 0   ;;  %v865_v1 = vmov 0.0   ;;  %v112_v2 = vld [vmem:[#allocation7] sm:$0xff] }
  0x6d   :  { %625 = vmatprep.subr.bf16.mxu1 %v863_v0  ;;  %622 = vmatprep.subr.bf16.mxu0 %v863_v0  ;;  %v113_v3 = vld [vmem:[#allocation7 + $0x8] sm:$0xff]  ;;  %v117_v4 = vld [vmem:[#allocation8] sm:$0xff]  ;;  %v114_v7 = vld [vmem:[#allocation7 + $0x10] sm:$0xff]  ;;  %vm119_vm1 = vcmask 130048   ;;  %vm193_vm2 = vcmask 261120   ;;  %s866_s17 = smov [#allocation13]  }
  0x6e   :  { %538 = vmatprep.mubr.msk.f32.mxu0 %vm864_vm0, %v865_v1  ;;  %549 = vmatprep.mubr.msk.f32.mxu1 %vm864_vm0, %v865_v1  ;;  %v626_v5 = vpack.c.bf16 %v113_v3, %v112_v2  ;;  %v118_v6 = vld [vmem:[#allocation8 + $0x8] sm:$0xff]  ;;  %v115_v8 = vld [vmem:[#allocation7 + $0x18] sm:$0xff]  ;;  %v278_v10 = vld [vmem:[#allocation10] sm:$0xff]  ;;  %s475_s18 = sshll.u32 %s866_s17, 4  ;;  %s476_s18 = int_to_ptr.vmem [resolvable:$true] %s475_s18 }
  0x6f   :  { %v623_v9 = vpack.c.bf16 %v118_v6, %v117_v4  ;;  %v629_v11 = vpack.c.bf16 %v115_v8, %v114_v7  ;;  %v279_v12 = vld [vmem:[#allocation10 + $0x8] sm:$0xff]  ;;  %v280_v15 = vld [vmem:[#allocation10 + $0x10] sm:$0xff]  ;;  %v281_v16 = vld [vmem:[#allocation10 + $0x18] sm:$0xff]  ;;  %p828_p7 = scmp.lt.s32.totalorder %s476_s18, %s476_s18 }
  0x70   :  { %627 = vmatpush3.bf16.msra.mxu1 %v626_v5  ;;  %v116_v13 = vld [vmem:[#allocation5] sm:$0xff]  ;;  %v632_v14 = vpack.c.bf16 %v279_v12, %v278_v10  ;;  %v111_v17 = vld [vmem:[#allocation2] sm:$0xff]  ;;  %v635_v18 = vpack.c.bf16 %v281_v16, %v280_v15  ;;  %v284_v22 = vld [vmem:[#allocation10 + $0x30] sm:$0xff] }
  0x71   :  { %624 = vmatpush3.bf16.msra.mxu0 %v623_v9  ;;  %628 = vmatprep.subr.bf16.mxu1 %v863_v0  ;;  %v282_v19 = vld [vmem:[#allocation10 + $0x20] sm:$0xff]  ;;  %v283_v20 = vld [vmem:[#allocation10 + $0x28] sm:$0xff]  ;;  %v285_v23 = vld [vmem:[#allocation10 + $0x38] sm:$0xff] }
  0x72   :  { %631 = vmatprep.subr.bf16.mxu0 %v863_v0  ;;  %v638_v21 = vpack.c.bf16 %v283_v20, %v282_v19  ;;  %v641_v24 = vpack.c.bf16 %v285_v23, %v284_v22  ;;  %v286_v25 = vld [vmem:[#allocation10 + $0x40] sm:$0xff]  ;;  %v287_v26 = vld [vmem:[#allocation10 + $0x48] sm:$0xff]  ;;  %v288_v28 = vld [vmem:[#allocation10 + $0x50] sm:$0xff] }
  0x73   :  { %v644_v27 = vpack.c.bf16 %v287_v26, %v286_v25  ;;  %v289_v29 = vld [vmem:[#allocation10 + $0x58] sm:$0xff]  ;;  %v290_v31 = vld [vmem:[#allocation10 + $0x60] sm:$0xff]  ;;  %v291_v32 = vld [vmem:[#allocation10 + $0x68] sm:$0xff] }
  0x74   :  { %630 = vmatpush3.bf16.msra.mxu1 %v629_v11  ;;  %539 = vmatmul.mubr.msk.f32.vlgmr.msra.gmra.mrb[0].mxu0 %vm119_vm1, %v116_v13  ;;  %v647_v30 = vpack.c.bf16 %v289_v29, %v288_v28  ;;  %v650_v33 = vpack.c.bf16 %v291_v32, %v290_v31  ;;  %v292_v34 = vld [vmem:[#allocation10 + $0x70] sm:$0xff]  ;;  %v293_v35 = vld [vmem:[#allocation10 + $0x78] sm:$0xff]  ;;  %v374_v37 = vld [vmem:[#allocation11] sm:$0xff] }
  0x75   :  { %633 = vmatpush3.bf16.msra.mxu0 %v632_v14  ;;  %584 = vmatprep.mubr.msk.f32.mxu0 %vm864_vm0, %v865_v1  ;;  %v653_v36 = vpack.c.bf16 %v293_v35, %v292_v34  ;;  %v375_v38 = vld [vmem:[#allocation11 + $0x8] sm:$0xff]  ;;  %v376_v39 = vld [vmem:[#allocation11 + $0x10] sm:$0xff]  ;;  %v377_v41 = vld [vmem:[#allocation11 + $0x18] sm:$0xff] }
  0x76   :  { %634 = vmatprep.subr.bf16.mxu0 %v863_v0  ;;  %655 = vmatprep.subr.bf16.mxu1 %v863_v0  ;;  %v656_v40 = vpack.c.bf16 %v375_v38, %v374_v37  ;;  %v659_v42 = vpack.c.bf16 %v377_v41, %v376_v39  ;;  %v378_v43 = vld [vmem:[#allocation11 + $0x20] sm:$0xff]  ;;  %v379_v44 = vld [vmem:[#allocation11 + $0x28] sm:$0xff]  ;;  %v380_v46 = vld [vmem:[#allocation11 + $0x30] sm:$0xff] }
  0x77   :  { %550 = vmatmul.mubr.msk.f32.vlgmr.msra.gmra.mrb[0].mxu1 %vm193_vm2, %v111_v17  ;;  %v662_v45 = vpack.c.bf16 %v379_v44, %v378_v43  ;;  %v381_v47 = vld [vmem:[#allocation11 + $0x38] sm:$0xff]  ;;  %v382_v49 = vld [vmem:[#allocation11 + $0x40] sm:$0xff]  ;;  %v383_v50 = vld [vmem:[#allocation11 + $0x48] sm:$0xff] }
  0x78   :  { %619 = vmatprep.mubr.msk.f32.mxu1 %vm864_vm0, %v865_v1  ;;  %657 = vmatpush3.bf16.msra.mxu1 %v656_v40  ;;  %v665_v48 = vpack.c.bf16 %v381_v47, %v380_v46  ;;  %v668_v51 = vpack.c.bf16 %v383_v50, %v382_v49  ;;  %v384_v52 = vld [vmem:[#allocation11 + $0x50] sm:$0xff]  ;;  %v385_v53 = vld [vmem:[#allocation11 + $0x58] sm:$0xff]  ;;  %v386_v55 = vld [vmem:[#allocation11 + $0x60] sm:$0xff] }
  0x79   :  { %636 = vmatpush3.bf16.msra.mxu0 %v635_v18  ;;  %658 = vmatprep.subr.bf16.mxu1 %v863_v0  ;;  %v671_v54 = vpack.c.bf16 %v385_v53, %v384_v52  ;;  %v387_v56 = vld [vmem:[#allocation11 + $0x68] sm:$0xff]  ;;  %v489_v61 = vld [vmem:[%s1049_s4] ss:$0 sm:$0xff]  ;;  %v388_v4 = vld [vmem:[#allocation11 + $0x70] sm:$0xff] }
  0x7a   :  { %637 = vmatprep.subr.bf16.mxu0 %v863_v0  ;;  %v674_v57 = vpack.c.bf16 %v387_v56, %v386_v55  ;;  %v389_v5 = vld [vmem:[#allocation11 + $0x78] sm:$0xff]  ;;  %v491_v12 = vld [vmem:[%s1053_s8] ss:$0 sm:$0xff] }
  0x7b   :  { %v677_v6 = vpack.c.bf16 %v389_v5, %v388_v4 }
  0x7c   :  { %660 = vmatpush3.bf16.msra.mxu1 %v659_v42 }
  0x7d   :  { %639 = vmatpush3.bf16.msra.mxu0 %v638_v21  ;;  %661 = vmatprep.subr.bf16.mxu1 %v863_v0 }
  0x7e   :  { %640 = vmatprep.subr.bf16.mxu0 %v863_v0 }
  0x80   :  { %663 = vmatpush3.bf16.msra.mxu1 %v662_v45 }
  0x81   :  { %642 = vmatpush3.bf16.msra.mxu0 %v641_v24  ;;  %664 = vmatprep.subr.bf16.mxu1 %v863_v0 }
  0x82   :  { %643 = vmatprep.subr.bf16.mxu0 %v863_v0 }
  0x84   :  { %666 = vmatpush3.bf16.msra.mxu1 %v665_v48 }
  0x85   :  { %645 = vmatpush3.bf16.msra.mxu0 %v644_v27  ;;  %667 = vmatprep.subr.bf16.mxu1 %v863_v0 }
  0x86   :  { %646 = vmatprep.subr.bf16.mxu0 %v863_v0 }
  0x88   :  { %669 = vmatpush3.bf16.msra.mxu1 %v668_v51 }
  0x89   :  { %648 = vmatpush3.bf16.msra.mxu0 %v647_v30  ;;  %670 = vmatprep.subr.bf16.mxu1 %v863_v0 }
  0x8a   :  { %649 = vmatprep.subr.bf16.mxu0 %v863_v0 }
  0x8c   :  { %672 = vmatpush3.bf16.msra.mxu1 %v671_v54 }
  0x8d   :  { %651 = vmatpush3.bf16.msra.mxu0 %v650_v33  ;;  %673 = vmatprep.subr.bf16.mxu1 %v863_v0 }
  0x8e   :  { %652 = vmatprep.subr.bf16.mxu0 %v863_v0 }
  0x90   :  { %675 = vmatpush3.bf16.msra.mxu1 %v674_v57 }
  0x91   :  { %654 = vmatpush3.bf16.msra.mxu0 %v653_v36  ;;  %676 = vmatprep.subr.bf16.mxu1 %v863_v0  ;;  %v490_v0 = vld [vmem:[%s1051_s6] ss:$0 sm:$0xff]  ;;  %s823_s6 = scalar_lea.vmem %s476_s18, 128 }
  0x92   :  { %p824_p6 = scmp.ne.s32.totalorder %s476_s18, %s823_s6  ;;  %p829_p8 = scmp.lt.s32.totalorder %s823_s6, %s823_s6 }
  0x94   :  { %678 = vmatpush3.bf16.msra.mxu1 %v677_v6  ;;  %p830_p9 = por %p829_p8, %p828_p7 }
  0x96   :  { %p831_p10 = pnand %p830_p9, %p824_p6 }
 0x147   :  { %v189_v58 = vpop.f32.mrb[0].mxu0 }
 0x148   :  { %v540_v59 = vpop.f32.mrb[1].mxu0 }
 0x14a   :  { %v263_v60 = vpop.f32.mrb[0].mxu1 }
 0x14b   :  { %v264_v62 = vadd.f32 %v263_v60, %v189_v58  ;;  %v551_v63 = vpop.f32.mrb[1].mxu1 }
 0x14d   :  { %v274_v1 = vadd.f32 %v489_v61, %v264_v62 }
 0x14f   :  { %v276_v2 = vmul.f32 0.2, %v274_v1  ;;  %vm275_vm3 = vcmp.ge.f32.partialorder %v274_v1, 0.0 }
 0x151   :  { %v277_v3 = vsel %vm275_vm3, %v274_v1, %v276_v2 }
 0x152   :  { %585 = vmatmul.mubr.f32.vlgmr.msra.gmra.mrb[2].mxu0 %v277_v3 }
 0x225   :  { %v367_v7 = vpop.f32.mrb[2].mxu0 }
 0x226   :  { %v368_v8 = vadd.f32 %v490_v0, %v367_v7  ;;  %v586_v9 = vpop.f32.mrb[3].mxu0 }
 0x228   :  { %vm371_vm4 = vcmp.ge.f32.partialorder %v368_v8, 0.0  ;;  %v372_v10 = vmul.f32 0.2, %v368_v8 }
 0x22a   :  { %v373_v11 = vsel %vm371_vm4, %v368_v8, %v372_v10 }
 0x22b   :  { %620 = vmatmul.mubr.f32.vlgmr.msra.gmra.mrb[2].mxu1 %v373_v11 }
 0x2fe   :  { %v463_v13 = vpop.f32.mrb[2].mxu1 }
 0x2ff   :  { %v464_v14 = vadd.f32 %v491_v12, %v463_v13  ;;  %v621_v15 = vpop.f32.mrb[3].mxu1 }
 0x301   :  { %v467_v16 = vadd.f32 %v464_v14, %v373_v11 }
 0x303   :  { %468 = vst [vmem:[#allocation13] sm:$0xff] %v467_v16 }
 0x304   :  { %834 = shalt.err (!%p831_p10)
}
 0x305   :  { %s835_s21 = scalar_lea.hbm %s1054_s9, 128 }
 0x306   :  { %p836_p11 = scmp.ne.s32.totalorder %s1054_s9, %s835_s21  ;;  %p839_p12 = scmp.lt.u32.totalorder %s835_s21, %s1054_s9 }
 0x308   :  { %p841_p13 = pnand %p839_p12, %p836_p11 }
 0x30a   :  { %844 = shalt.err (!%p841_p13)
}
 0x30b   :  { %478 = dma.vmem_to_hbm [thread:$0]  %s476_s18, 128, %s1054_s9, [#allocation4]  }
 0x30c   :  { %853 = dma.done.wait [#allocation4], 128  }
 0x30d   :  { %854 = vsyncadd [#allocation4], 4294967168 }
 0x30e   :  { %482 = vsyncpa [#allocation3], 1 }
 0x30f   :  { %483 = vsyncpa [#allocation6], 1 }
 0x310   :  { %484 = vsyncpa [#allocation9], 1 }
 0x311   :  { %485 = vsyncpa [#allocation12], 1 }
 0x312   :  { %486 = vsyncpa [#allocation4], 1 }

</bundles_post_ra>
